<compile_context>
chip_gen: v5e
topology: v5e:2x2
jax: 0.10.0
libtpu: 0.0.40
codegen_flags: <defaults>
</compile_context>

<pallas_src>
import functools

import jax
import jax.numpy as jnp
from jax.experimental import pallas as pl
from jax.experimental.pallas import tpu as pltpu

NEG_INF = -1e30  # Python float: never capture traced scalars inside the kernel.


def _round_up(a: int, b: int) -> int:
    return (a + b - 1) // b * b


def _vmem_budget_bytes() -> int:
    """~70% of physical VMEM (128 MiB v5e/v6e, 64 MiB v7x), capped at 100 MiB."""
    cap = 64 * 1024 * 1024
    try:
        info = pltpu.get_tpu_info()
        cap = int(getattr(info, "vmem_capacity_bytes", cap) or cap)
    except Exception:
        pass
    return min(int(cap * 0.70), 100 * 1024 * 1024)


def prepare_lm_head_weight(weight, *, lane_multiple: int = 128):
    """Hoisted (once-per-parameter, NOT per-call) weight prep.

    Casts the [V, D] torch-nn.Linear-layout weight to bf16 and pads V up to a lane multiple,
    so the forward hot path never materializes an HBM copy of the weight.
    """
    v, _ = weight.shape
    w = weight if weight.dtype == jnp.bfloat16 else weight.astype(jnp.bfloat16)
    v_pad = _round_up(v, lane_multiple)
    if v_pad != v:
        w = jnp.pad(w, ((0, v_pad - v), (0, 0)))
    return w


# ---------------------------------------------------------------------------
# Kernel 1: resident-weight, single-pass log_softmax (small/medium vocab, tiny D).
# ---------------------------------------------------------------------------
def _resident_kernel(vocab_size, needs_col_mask, x_ref, w_ref, out_ref):
    # x_ref: (tm, D) bf16 row tile; w_ref: (v_pad, D) bf16 (whole weight, VMEM-resident);
    # out_ref: (tm, v_pad) out_dtype.
    logits = jax.lax.dot_general(
        x_ref[...], w_ref[...],
        dimension_numbers=(((1,), (1,)), ((), ())),   # x @ W^T, no HBM transpose of W
        preferred_element_type=jnp.float32,
    )
    if needs_col_mask:  # trace-time gate; only emitted when V was padded
        col = jax.lax.broadcasted_iota(jnp.int32, logits.shape, 1)
        logits = jnp.where(col < vocab_size, logits, NEG_INF)
    m = jnp.max(logits, axis=-1, keepdims=True)
    lse = m + jnp.log(jnp.sum(jnp.exp(logits - m), axis=-1, keepdims=True))
    out_ref[...] = (logits - lse).astype(out_ref.dtype)


# ---------------------------------------------------------------------------
# Kernel 2: two-phase online log-sum-exp (vocab streamed in tiles).
# ---------------------------------------------------------------------------
def _twophase_body(x_ref, w_ref, bias_ref, out_ref, m_ref, l_ref):
    p = pl.program_id(1)   # phase: 0 = accumulate (m, l), 1 = normalize + store
    j = pl.program_id(2)   # vocab-tile index

    logits = jax.lax.dot_general(
        x_ref[...], w_ref[...],
        dimension_numbers=(((1,), (1,)), ((), ())),
        preferred_element_type=jnp.float32,
    )  # (tm, tv) f32
    if bias_ref is not None:
        # Additive column mask: 0 on valid columns, -1e30 on padded ones. Single VPU add
        # per tile (replaces iota+cmp+select), and it's an input, not a captured constant.
        logits = logits + bias_ref[...]

    @pl.when(jnp.logical_and(p == 0, j == 0))
    def _init():
        m_ref[...] = jnp.full(m_ref.shape, NEG_INF, dtype=jnp.float32)
        l_ref[...] = jnp.zeros(l_ref.shape, dtype=jnp.float32)

    @pl.when(p == 0)
    def _accumulate():
        m_prev = m_ref[...]
        m_new = jnp.maximum(m_prev, jnp.max(logits, axis=-1, keepdims=True))
        l_ref[...] = (l_ref[...] * jnp.exp(m_prev - m_new)
                      + jnp.sum(jnp.exp(logits - m_new), axis=-1, keepdims=True))
        m_ref[...] = m_new

    @pl.when(jnp.logical_and(p == 1, j == 0))
    def _fold_lse_once():
        # Compute lse = m + log(l) once per row tile; reused by every finalize tile below.
        m_ref[...] = m_ref[...] + jnp.log(l_ref[...])

    @pl.when(p == 1)
    def _finalize():
        out_ref[...] = (logits - m_ref[...]).astype(out_ref.dtype)


def _twophase_kernel_masked(x_ref, w_ref, bias_ref, out_ref, m_ref, l_ref):
    _twophase_body(x_ref, w_ref, bias_ref, out_ref, m_ref, l_ref)


def _twophase_kernel(x_ref, w_ref, out_ref, m_ref, l_ref):
    _twophase_body(x_ref, w_ref, None, out_ref, m_ref, l_ref)


# ---------------------------------------------------------------------------
# Wrapper
# ---------------------------------------------------------------------------
def mamba_projection(x, weight, *, vocab_size=None, tm=None, tv=None,
                     out_dtype=jnp.float32, vmem_budget_bytes=None,
                     force_two_phase=False):
    """log_softmax(x @ weight.T, axis=-1), matching torch MambaProjection.forward.

    x: [..., D]; weight: [V_stored, D] in torch nn.Linear layout — ideally produced once by
    prepare_lm_head_weight (bf16, V padded to a multiple of 128) so the hot path does no
    per-call weight copies. vocab_size: logical vocab V (<= V_stored).
    """
    *lead, D = x.shape
    V_stored, Dw = weight.shape
    assert Dw == D, "weight must be [V, D] (torch nn.Linear layout)"
    V = int(vocab_size) if vocab_size is not None else V_stored
    assert 0 < V <= V_stored
    M = 1
    for s in lead:
        M *= int(s)

    out_bytes = jnp.dtype(out_dtype).itemsize
    budget = int(vmem_budget_bytes) if vmem_budget_bytes is not None else _vmem_budget_bytes()

    # bf16 MXU operands (f32 accumulation). Casts are no-ops if inputs are already bf16;
    # use prepare_lm_head_weight to hoist the weight cast/pad out of the hot path.
    x2d = x.reshape(M, D)
    if x2d.dtype != jnp.bfloat16:
        x2d = x2d.astype(jnp.bfloat16)
    w = weight if weight.dtype == jnp.bfloat16 else weight.astype(jnp.bfloat16)

    # --------------------------- path selection ---------------------------
    v128 = _round_up(V_stored, 128)
    w_resident_bytes = 2 * v128 * D * 2          # conservatively count double-buffering
    use_resident = (not force_two_phase) and (w_resident_bytes <= budget // 2)

    m16 = _round_up(M, 16)
    # Keep >= 2 row tiles when M allows so the only "parallel" grid axis can feed both
    # TensorCores on v7x (megacore); otherwise one tile is fine.
    tm_cap_cores = m16 if m16 < 32 else _round_up(m16 // 2, 16)

    if use_resident:
        # ---------------- resident-weight single-pass path ----------------
        v_pad = v128
        if V_stored != v_pad:
            w = jnp.pad(w, ((0, v_pad - V_stored), (0, 0)))   # avoided by prepare_lm_head_weight

        per_row = 2 * D * 2 + 2 * v_pad * out_bytes + v_pad * 4   # x dbuf + out dbuf + f32 logits
        tm_cap_vmem = max(16, (budget - w_resident_bytes) // per_row)
        tm_eff = tm if tm is not None else 1024
        tm_eff = max(16, (min(tm_eff, tm_cap_vmem, tm_cap_cores, m16) // 16) * 16)
        m_pad = _round_up(M, tm_eff)
        if m_pad != M:
            x2d = jnp.pad(x2d, ((0, m_pad - M), (0, 0)))

        needs_col_mask = v_pad != V
        kernel = functools.partial(_resident_kernel, V, needs_col_mask)

        out2d = pl.pallas_call(
            kernel,
            out_shape=jax.ShapeDtypeStruct((m_pad, v_pad), out_dtype),
            grid_spec=pltpu.PrefetchScalarGridSpec(
                num_scalar_prefetch=0,
                grid=(m_pad // tm_eff,),
                in_specs=[
                    pl.BlockSpec((tm_eff, D), lambda i: (i, 0)),
                    pl.BlockSpec((v_pad, D), lambda i: (0, 0)),   # whole weight, VMEM-resident
                ],
                out_specs=pl.BlockSpec((tm_eff, v_pad), lambda i: (i, 0)),
            ),
            compiler_params=pltpu.CompilerParams(
                dimension_semantics=("parallel",),
                vmem_limit_bytes=budget,
            ),
        )(x2d, w)
        return out2d[:M, :V].reshape(*lead, V)

    # ------------------- two-phase online-LSE path (large vocab) -------------------
    if V_stored % 128 == 0:
        v_pad = V_stored                       # pre-padded weight: zero per-call copies
    else:
        v_pad = _round_up(V_stored, 128)
        w = jnp.pad(w, ((0, v_pad - V_stored), (0, 0)))  # avoided by prepare_lm_head_weight

    tv_req = tv if tv is not None else 1024    # multiple of 256 by default (MXU-friendly)
    tv_eff = max(128, (min(_round_up(tv_req, 128), v_pad) // 128) * 128)
    while v_pad % tv_eff != 0:
        tv_eff -= 128

    w_tile_bytes = 2 * tv_eff * D * 2
    per_row = 2 * D * 2 + 2 * tv_eff * out_bytes + tv_eff * 4 + 8
    tm_cap_vmem = max(16, (budget - w_tile_bytes) // per_row)
    tm_eff = tm if tm is not None else 512
    tm_eff = max(16, (min(tm_eff, tm_cap_vmem, tm_cap_cores, m16) // 16) * 16)
    m_pad = _round_up(M, tm_eff)
    if m_pad != M:
        x2d = jnp.pad(x2d, ((0, m_pad - M), (0, 0)))

    needs_col_mask = v_pad != V
    grid = (m_pad // tm_eff, 2, v_pad // tv_eff)

    in_specs = [
        pl.BlockSpec((tm_eff, D), lambda i, p, j: (i, 0)),   # row tile, resident across p/j
        pl.BlockSpec((tv_eff, D), lambda i, p, j: (j, 0)),   # vocab tile of [V, D] weight
    ]
    args = [x2d, w]
    if needs_col_mask:
        col_bias = jnp.where(jnp.arange(v_pad) < V, 0.0, NEG_INF).astype(jnp.float32)
        col_bias = col_bias.reshape(1, v_pad)
        in_specs.append(pl.BlockSpec((1, tv_eff), lambda i, p, j: (0, j)))
        args.append(col_bias)
        kernel = _twophase_kernel_masked
    else:
        kernel = _twophase_kernel

    out2d = pl.pallas_call(
        kernel,
        out_shape=jax.ShapeDtypeStruct((m_pad, v_pad), out_dtype),
        grid_spec=pltpu.PrefetchScalarGridSpec(
            num_scalar_prefetch=0,
            grid=grid,
            in_specs=in_specs,
            # Phase 0: out block pinned at (i, 0) -> never flushed while (m, l) accumulate.
            # Phase 1: each (i, j) block is written exactly once, lane-dense.
            out_specs=pl.BlockSpec((tm_eff, tv_eff), lambda i, p, j: (i, j * p)),
            scratch_shapes=[
                pltpu.VMEM((tm_eff, 1), jnp.float32),   # running max m (becomes lse in phase 1)
                pltpu.VMEM((tm_eff, 1), jnp.float32),   # running sum-exp l
            ],
        ),
        compiler_params=pltpu.CompilerParams(
            dimension_semantics=("parallel", "arbitrary", "arbitrary"),
            vmem_limit_bytes=budget,
        ),
    )(*args)
    return out2d[:M, :V].reshape(*lead, V)


def _reference(x, weight_unpadded):
    """Matches kernel numerics: bf16 MXU operands, f32 accumulation, f32 softmax."""
    logits = jnp.einsum(
        "...d,vd->...v",
        x.astype(jnp.bfloat16), weight_unpadded.astype(jnp.bfloat16),
        preferred_element_type=jnp.float32,
    )
    return jax.nn.log_softmax(logits, axis=-1)


if __name__ == "__main__":
    key = jax.random.PRNGKey(0)
    k1, k2, k3, k4, k5, k6 = jax.random.split(key, 6)

    # --- Test 1: module-spec shapes (d_model=32, vocab=256, B=2, L=8); resident-weight path.
    B, L, D, V = 2, 8, 32, 256
    x = jax.random.normal(k1, (B, L, D), dtype=jnp.float32)
    w_raw = jax.random.normal(k2, (V, D), dtype=jnp.float32) / jnp.sqrt(D)
    w = prepare_lm_head_weight(w_raw)       # hoisted bf16 cast + pad (once, not per call)

    out = jax.block_until_ready(mamba_projection(x, w, vocab_size=V))
    assert out.shape == (B, L, V) and out.dtype == jnp.float32
    ref = _reference(x, w_raw)
    assert jnp.allclose(out, ref, atol=5e-3, rtol=5e-3), "resident path mismatch (f32)"
    assert jnp.allclose(jnp.sum(jnp.exp(out), axis=-1), 1.0, atol=2e-3)

    # --- Test 2: resident path with several row tiles (grid[0] > 1, parallel axis).
    B2, L2 = 2, 64
    x2 = jax.random.normal(k3, (B2, L2, D), dtype=jnp.float32)
    out2 = jax.block_until_ready(mamba_projection(x2, w, vocab_size=V, tm=32))
    ref2 = _reference(x2, w_raw)
    assert out2.shape == (B2, L2, V)
    assert jnp.allclose(out2, ref2, atol=5e-3, rtol=5e-3), "resident multi-row-tile mismatch"

    # --- Test 3: two-phase path (forced): ragged M & V, multiple row + vocab tiles,
    #     padded-vocab additive mask, per-row-tile (m,l) re-init, pinned-output regression,
    #     bf16 output.
    B3, L3, D3, V3 = 2, 40, 32, 200
    x3 = jax.random.normal(k4, (B3, L3, D3), dtype=jnp.float32)
    w3_raw = jax.random.normal(k5, (V3, D3), dtype=jnp.float32) / jnp.sqrt(D3)
    w3 = prepare_lm_head_weight(w3_raw)      # pads V: 200 -> 256, once
    out3 = jax.block_until_ready(
        mamba_projection(x3, w3, vocab_size=V3, tm=16, tv=128,
                         out_dtype=jnp.bfloat16, force_two_phase=True))
    assert out3.shape == (B3, L3, V3) and out3.dtype == jnp.bfloat16
    ref3 = _reference(x3, w3_raw)
    out3_f32 = out3.astype(jnp.float32)
    assert jnp.allclose(out3_f32, ref3, atol=1.5e-1, rtol=5e-2), "two-phase masked mismatch"
    assert jnp.allclose(jnp.sum(jnp.exp(out3_f32), axis=-1), 1.0, atol=5e-2)

    # --- Test 4: two-phase path without masking (V a multiple of the vocab tile), f32 out.
    x4 = jax.random.normal(k6, (2, 24, D), dtype=jnp.float32)
    out4 = jax.block_until_ready(
        mamba_projection(x4, w, vocab_size=V, tm=16, tv=128, force_two_phase=True))
    ref4 = _reference(x4, w_raw)
    assert out4.shape == (2, 24, V)
    assert jnp.allclose(out4, ref4, atol=5e-3, rtol=5e-3), "two-phase unmasked mismatch"

    print("KERNEL_OK")
</pallas_src>

<mosaic_0001>
module attributes {stable_mosaic.version = 11 : i64} {
  func.func @_resident_kernel(%arg0: i32, %arg1: memref<16x32xbf16, #tpu.memory_space<vmem>>, %arg2: memref<256x32xbf16, #tpu.memory_space<vmem>>, %arg3: memref<16x256xf32, #tpu.memory_space<vmem>>) attributes {dimension_semantics = [#tpu.dimension_semantics<parallel>], iteration_bounds = array<i64: 1>, scalar_prefetch = 0 : i64, scratch_operands = 0 : i64, tpu.core_type = #tpu.core_type<tc>, window_params = [{transform_indices = @transform_0, window_bounds = array<i64: 16, 32>}, {pipeline_mode = #tpu.pipeline_mode<synchronous>, transform_indices = @transform_1, window_bounds = array<i64: 256, 32>}, {transform_indices = @transform_2, window_bounds = array<i64: 16, 256>}]} {
    %c0 = arith.constant 0 : index
    %c0_0 = arith.constant 0 : index
    %0 = vector.load %arg1[%c0, %c0_0] : memref<16x32xbf16, #tpu.memory_space<vmem>>, vector<16x32xbf16>
    %c0_1 = arith.constant 0 : index
    %c0_2 = arith.constant 0 : index
    %1 = vector.load %arg2[%c0_1, %c0_2] : memref<256x32xbf16, #tpu.memory_space<vmem>>, vector<256x32xbf16>
    %cst = arith.constant dense<0.000000e+00> : vector<16x256xf32>
    %2 = tpu.matmul %0, %1, %cst {dimension_numbers = #tpu.dot_dimension_numbers<[1], [1], [0], [0], [0, 0, 1, 0], [], []>} : vector<16x32xbf16>, vector<256x32xbf16>, vector<16x256xf32> -> vector<16x256xf32>
    %cst_3 = arith.constant dense<0xFF800000> : vector<16xf32>
    %3 = vector.multi_reduction <maximumf>, %2, %cst_3 [1] : vector<16x256xf32> to vector<16xf32>
    %4 = vector.shape_cast %3 : vector<16xf32> to vector<16x1xf32>
    %5 = vector.broadcast %4 : vector<16x1xf32> to vector<16x256xf32>
    %6 = arith.subf %2, %5 : vector<16x256xf32>
    %7 = math.exp %6 : vector<16x256xf32>
    %cst_4 = arith.constant dense<0.000000e+00> : vector<16xf32>
    %8 = vector.multi_reduction <add>, %7, %cst_4 [1] : vector<16x256xf32> to vector<16xf32>
    %9 = vector.shape_cast %8 : vector<16xf32> to vector<16x1xf32>
    %10 = math.log %9 : vector<16x1xf32>
    %11 = arith.addf %4, %10 : vector<16x1xf32>
    %12 = vector.broadcast %11 : vector<16x1xf32> to vector<16x256xf32>
    %13 = arith.subf %2, %12 : vector<16x256xf32>
    %c0_5 = arith.constant 0 : index
    %c0_6 = arith.constant 0 : index
    %14 = vector.load %arg3[%c0_5, %c0_6] : memref<16x256xf32, #tpu.memory_space<vmem>>, vector<16x256xf32>
    tpu.vector_store %arg3[%c0_5, %c0_6], %13 {strides = array<i32>} : memref<16x256xf32, #tpu.memory_space<vmem>>, vector<16x256xf32>,
    return
  }
  func.func @transform_0(%arg0: i32) -> (i32, i32) {
    %c0_i32 = arith.constant 0 : i32
    %c0_i32_0 = arith.constant 0 : i32
    return %arg0, %c0_i32 : i32, i32
  }
  func.func @transform_1(%arg0: i32) -> (i32, i32) {
    %c0_i32 = arith.constant 0 : i32
    %c0_i32_0 = arith.constant 0 : i32
    %c0_i32_1 = arith.constant 0 : i32
    return %c0_i32, %c0_i32_0 : i32, i32
  }
  func.func @transform_2(%arg0: i32) -> (i32, i32) {
    %c0_i32 = arith.constant 0 : i32
    %c0_i32_0 = arith.constant 0 : i32
    return %arg0, %c0_i32 : i32, i32
  }
}

</mosaic_0001>

<bundles_post_ra>
// kernel: tpu_custom_call.1
= control target key start
LH: loop header
LB: loop body
LE: loop exit
PB: predicated region body
PF: predicated region fallthrough
CT: control target
= control target key end

     0   :  { %vm131_vm0 = vcmask 261120   ;;  %s485_s0 = inlined_call_operand.vmem [shape: bf16[16,32], index: 0, kind: input, shape index: {}]   ;;  %s486_s1 = inlined_call_operand.vmem [shape: bf16[256,32], index: 1, kind: input, shape index: {}]   ;;  %s487_s2 = inlined_call_operand.hbm [shape: f32[16,256], index: 2, kind: output, shape index: {}]  }
   0x1   :  { %v345_v0 = vld [vmem:[%s486_s1 + $0x38] sm:$0xff]  ;;  %v344_v4 = vld [vmem:[%s486_s1 + $0x30] sm:$0xff] }
   0x2   :  { %v353_v1 = vld [vmem:[%s486_s1 + $0x78] sm:$0xff]  ;;  %v157_v2 = vsel %vm131_vm0, %v345_v0, 0  ;;  %v352_v5 = vld [vmem:[%s486_s1 + $0x70] sm:$0xff] }
   0x3   :  { %v181_v3 = vsel %vm131_vm0, %v353_v1, 0  ;;  %183 = vmatpush.bf16.xpose.msra.mxu0 %v157_v2 }
   0x4   :  { %197 = vmatpush.bf16.xpose.msra.mxu1 %v181_v3 }
   0x5   :  { %7 = vsyncpa [#allocation3], 0  ;;  %v154_v6 = vsel %vm131_vm0, %v344_v4, 0  ;;  %v178_v7 = vsel %vm131_vm0, %v352_v5, 0  ;;  %v343_v8 = vld [vmem:[%s486_s1 + $0x28] sm:$0xff]  ;;  %v342_v12 = vld [vmem:[%s486_s1 + $0x20] sm:$0xff] }
   0x6   :  { %v351_v9 = vld [vmem:[%s486_s1 + $0x68] sm:$0xff]  ;;  %v151_v10 = vsel %vm131_vm0, %v343_v8, 0  ;;  %v350_v13 = vld [vmem:[%s486_s1 + $0x60] sm:$0xff]  ;;  %v148_v14 = vsel %vm131_vm0, %v342_v12, 0  ;;  %v341_v16 = vld [vmem:[%s486_s1 + $0x18] sm:$0xff]  ;;  %s255_s17 = sshll.u32 %s487_s2, 4  ;;  %s256_s17 = int_to_ptr.hbm [resolvable:$true] %s255_s17 }
   0x7   :  { %v175_v11 = vsel %vm131_vm0, %v351_v9, 0  ;;  %v172_v15 = vsel %vm131_vm0, %v350_v13, 0  ;;  %v349_v17 = vld [vmem:[%s486_s1 + $0x58] sm:$0xff]  ;;  %v145_v18 = vsel %vm131_vm0, %v341_v16, 0  ;;  %v340_v20 = vld [vmem:[%s486_s1 + $0x10] sm:$0xff]  ;;  %v339_v24 = vld [vmem:[%s486_s1 + $0x8] sm:$0xff] }
   0x8   :  { %v169_v19 = vsel %vm131_vm0, %v349_v17, 0  ;;  %v348_v21 = vld [vmem:[%s486_s1 + $0x50] sm:$0xff]  ;;  %v142_v22 = vsel %vm131_vm0, %v340_v20, 0  ;;  %v347_v25 = vld [vmem:[%s486_s1 + $0x48] sm:$0xff]  ;;  %v139_v26 = vsel %vm131_vm0, %v339_v24, 0  ;;  %v338_v28 = vld [vmem:[%s486_s1] sm:$0xff] }
   0x9   :  { %v166_v23 = vsel %vm131_vm0, %v348_v21, 0  ;;  %v163_v27 = vsel %vm131_vm0, %v347_v25, 0  ;;  %v346_v29 = vld [vmem:[%s486_s1 + $0x40] sm:$0xff]  ;;  %v136_v30 = vsel %vm131_vm0, %v338_v28, 0  ;;  %s396_s18 = smov 256   ;;  %s397_s19 = smov 16  }
   0xa   :  { %v160_v31 = vsel %vm131_vm0, %v346_v29, 0  ;;  %v337_v32 = vld [vmem:[%s485_s0] sm:$0xff]  ;;  %s395_s0 = smov [#allocation2]  }
   0xb   :  { %184 = vmatpush.bf16.xpose.msra.mxu0 %v154_v6  ;;  %s253_s1 = sshll.u32 %s395_s0, 4  ;;  %s254_s1 = int_to_ptr.vmem [resolvable:$true] %s253_s1 }
   0xc   :  { %198 = vmatpush.bf16.xpose.msra.mxu1 %v178_v7 }
  0x13   :  { %185 = vmatpush.bf16.xpose.msra.mxu0 %v151_v10 }
  0x14   :  { %199 = vmatpush.bf16.xpose.msra.mxu1 %v175_v11 }
  0x1b   :  { %186 = vmatpush.bf16.xpose.msra.mxu0 %v148_v14 }
  0x1c   :  { %200 = vmatpush.bf16.xpose.msra.mxu1 %v172_v15 }
  0x23   :  { %187 = vmatpush.bf16.xpose.msra.mxu0 %v145_v18 }
  0x24   :  { %201 = vmatpush.bf16.xpose.msra.mxu1 %v169_v19 }
  0x2b   :  { %188 = vmatpush.bf16.xpose.msra.mxu0 %v142_v22 }
  0x2c   :  { %202 = vmatpush.bf16.xpose.msra.mxu1 %v166_v23 }
  0x33   :  { %189 = vmatpush.bf16.xpose.msra.mxu0 %v139_v26 }
  0x34   :  { %203 = vmatpush.bf16.xpose.msra.mxu1 %v163_v27 }
  0x3b   :  { %190 = vmatpush.bf16.xpose.msra.mxu0 %v136_v30 }
  0x3c   :  { %204 = vmatpush.bf16.xpose.msra.mxu1 %v160_v31 }
  0x42   :  { %335 = vmatmul.msk.bf16.vlgmr.msra.gmra.mxu0 %vm131_vm0, %v337_v32 }
  0x43   :  { %336 = vmatmul.msk.bf16.vlgmr.msra.gmra.mxu1 %vm131_vm0, %v337_v32 }
  0xbf   :  { %v192_v33 = vpop.f32.mrf.mxu0 }
  0xc0   :  { %v206_v34 = vpop.f32.mrf.mxu1 }
  0xc1   :  { %v211_v35 = vmax.f32 %v192_v33, %v206_v34 }
  0xc3   :  { %212 = vmax.xlane.f32.xlu0 %v211_v35 }
  0xc7   :  { %v194_v36 = vpop.f32.mrf.mxu0 }
  0xc8   :  { %v208_v37 = vpop.f32.mrf.mxu1 }
  0xc9   :  { %v214_v38 = vmax.f32 %v194_v36, %v208_v37 }
  0xcb   :  { %215 = vmax.xlane.f32.xlu0 %v214_v38 }
 0x136   :  { %v213_v39 = vpop.xlane.xlu0 %212 }
 0x137   :  { %v217_v40 = vsub.f32 %v192_v33, %v213_v39  ;;  %v218_v41 = vsub.f32 %v206_v34, %v213_v39 }
 0x139   :  { %v221_v42 = vmul.f32 1.442695, %v217_v40  ;;  %v223_v43 = vmul.f32 1.442695, %v218_v41 }
 0x13b   :  { %357 = vpow2.f32 %v221_v42 }
 0x13c   :  { %359 = vpow2.f32 %v223_v43 }
 0x13e   :  { %v216_v44 = vpop.xlane.xlu0 %215 }
 0x13f   :  { %v219_v45 = vsub.f32 %v194_v36, %v216_v44  ;;  %v220_v46 = vsub.f32 %v208_v37, %v216_v44 }
 0x141   :  { %v358_v47 = vpop.eup %357  ;;  %v225_v48 = vmul.f32 1.442695, %v219_v45  ;;  %v227_v49 = vmul.f32 1.442695, %v220_v46 }
 0x142   :  { %v360_v50 = vpop.eup %359 }
 0x143   :  { %361 = vpow2.f32 %v225_v48  ;;  %v229_v51 = vadd.f32 %v360_v50, %v358_v47 }
 0x144   :  { %363 = vpow2.f32 %v227_v49 }
 0x145   :  { %230 = vadd.xlane.f32.xlu1 %v229_v51 }
 0x149   :  { %v362_v52 = vpop.eup %361 }
 0x14a   :  { %v364_v53 = vpop.eup %363 }
 0x14b   :  { %v232_v54 = vadd.f32 %v364_v53, %v362_v52 }
 0x14d   :  { %233 = vadd.xlane.f32.xlu1 %v232_v54 }
 0x1b8   :  { %v231_v55 = vpop.xlane.xlu1 %230 }
 0x1b9   :  { %365 = vlog2.f32 %v231_v55 }
 0x1bf   :  { %v366_v56 = vpop.eup %365 }
 0x1c0   :  { %v236_v57 = vmul.f32 0.6931472, %v366_v56  ;;  %v234_v58 = vpop.xlane.xlu1 %233 }
 0x1c1   :  { %367 = vlog2.f32 %v234_v58 }
 0x1c2   :  { %v239_v59 = vadd.f32 %v236_v57, %v213_v39 }
 0x1c4   :  { %v241_v60 = vsub.f32 %v192_v33, %v239_v59  ;;  %v242_v61 = vsub.f32 %v206_v34, %v239_v59 }
 0x1c6   :  { %245 = vst [vmem:[#allocation2] sm:$0xff] %v241_v60 }
 0x1c7   :  { %v368_v62 = vpop.eup %367  ;;  %246 = vst [vmem:[#allocation2 + $0x8] sm:$0xff] %v242_v61 }
 0x1c8   :  { %v238_v63 = vmul.f32 0.6931472, %v368_v62 }
 0x1ca   :  { %v240_v0 = vadd.f32 %v238_v63, %v216_v44 }
 0x1cc   :  { %v243_v1 = vsub.f32 %v194_v36, %v240_v0  ;;  %v244_v2 = vsub.f32 %v208_v37, %v240_v0 }
 0x1ce   :  { %247 = vst [vmem:[#allocation2 + $0x10] sm:$0xff] %v243_v1 }
 0x1cf   :  { %248 = vst [vmem:[#allocation2 + $0x18] sm:$0xff] %v244_v2 }
 0x1d0   :  { %261 = dma.vmem_to_hbm [thread:$0]  %s254_s1, 512, %s256_s17, [#allocation3], %s396_s18, %s396_s18, %s397_s19  }
 0x1d1   :  { %393 = dma.done.wait [#allocation3], 512  }
 0x1d2   :  { %394 = vsyncadd [#allocation3], 4294966784 }
 0x1d3   :  { %266 = vsyncpa [#allocation3], 1 }

</bundles_post_ra>
